<compile_context>
chip_gen: v5e
topology: v5e:2x2
jax: 0.10.0
libtpu: 0.0.40
codegen_flags: <defaults>
</compile_context>

<pallas_src>
import math

import jax
import jax.numpy as jnp
from jax import lax
from jax.experimental import pallas as pl
from jax.experimental.pallas import tpu as pltpu


_BLOCK_BYTES = 2 << 20          # ~2 MiB per input block (v7x-safe with 2x buffering)
_SQRT3 = 1.7320508075688772


# ----------------------------------------------------------------------------
# stateless in-kernel RNG (integer hash of the global element index)
# ----------------------------------------------------------------------------
def _hash_u32(x):
    # lowbias32-style avalanche hash on uint32 (VPU int ops only).
    x = x ^ (x >> jnp.uint32(16))
    x = x * jnp.uint32(0x7FEB352D)
    x = x ^ (x >> jnp.uint32(15))
    x = x * jnp.uint32(0x846CA68B)
    x = x ^ (x >> jnp.uint32(16))
    return x


def _mix_seed(seed, salt):
    # seed/salt are Python ints -> folded to a single uint32 constant.
    return jnp.uint32((seed * 2654435761 + salt * 40503 + 0x9E3779B9) & 0xFFFFFFFF)


def _uniform_from_idx(idx_i32, seed, salt):
    # one hash -> 24-bit uniform in [0, 1)
    h = _hash_u32(idx_i32.astype(jnp.uint32) + _mix_seed(seed, salt))
    v = (h & jnp.uint32(0xFFFFFF)).astype(jnp.int32).astype(jnp.float32)
    return v * jnp.float32(1.0 / (1 << 24))


def _normal_from_idx(idx_i32, seed, salt):
    # Irwin-Hall(4): two hashes -> four 16-bit uniforms -> approx N(0, 1).
    # TODO(synk): lighter tails than torch.randn (fine for noise augmentation).
    base = idx_i32.astype(jnp.uint32)
    h1 = _hash_u32(base + _mix_seed(seed, 2 * salt))
    h2 = _hash_u32(base + _mix_seed(seed, 2 * salt + 1))

    def lo(h):
        return (h & jnp.uint32(0xFFFF)).astype(jnp.int32).astype(jnp.float32)

    def hi(h):
        return (h >> jnp.uint32(16)).astype(jnp.int32).astype(jnp.float32)

    s = (lo(h1) + hi(h1) + lo(h2) + hi(h2)) * jnp.float32(1.0 / 65536.0)
    return (s - jnp.float32(2.0)) * jnp.float32(_SQRT3)


def _global_idx_2d(shape, row0, row_len):
    ri = lax.broadcasted_iota(jnp.int32, shape, 0) + row0
    ci = lax.broadcasted_iota(jnp.int32, shape, 1)
    return ri * jnp.int32(row_len) + ci


# ----------------------------------------------------------------------------
# generic tiled pallas_call helpers
# ----------------------------------------------------------------------------
def _largest_divisor(n, cap):
    cap = max(1, min(n, cap))
    for d in range(cap, 0, -1):
        if n % d == 0:
            return d
    return 1


def _ew2d_call(body, arrays, out_dtype):
    """arrays: list of identically-shaped (R, L) arrays.  body(row0, *vals)->(bp, L)."""
    R, L = arrays[0].shape
    bp = _largest_divisor(R, max(1, _BLOCK_BYTES // (L * 4)))

    def kernel(*refs):
        o_ref = refs[-1]
        vals = [r[...] for r in refs[:-1]]
        row0 = pl.program_id(0) * bp
        o_ref[...] = body(row0, *vals).astype(out_dtype)

    return pl.pallas_call(
        kernel,
        grid=(R // bp,),
        in_specs=[pl.BlockSpec((bp, L), lambda i: (i, 0)) for _ in arrays],
        out_specs=pl.BlockSpec((bp, L), lambda i: (i, 0)),
        out_shape=jax.ShapeDtypeStruct((R, L), out_dtype),
        compiler_params=pltpu.CompilerParams(dimension_semantics=("parallel",)),
    )(*arrays)


def _ew3d_call(body, arrays, out_dtype):
    """arrays: list of identically-shaped (P, H, W) arrays.  body(p0, *vals)->(bp,H,W)."""
    P, H, W = arrays[0].shape
    bp = _largest_divisor(P, max(1, _BLOCK_BYTES // (H * W * 4)))

    def kernel(*refs):
        o_ref = refs[-1]
        vals = [r[...] for r in refs[:-1]]
        p0 = pl.program_id(0) * bp
        o_ref[...] = body(p0, *vals).astype(out_dtype)

    return pl.pallas_call(
        kernel,
        grid=(P // bp,),
        in_specs=[pl.BlockSpec((bp, H, W), lambda i: (i, 0, 0)) for _ in arrays],
        out_specs=pl.BlockSpec((bp, H, W), lambda i: (i, 0, 0)),
        out_shape=jax.ShapeDtypeStruct((P, H, W), out_dtype),
        compiler_params=pltpu.CompilerParams(dimension_semantics=("parallel",)),
    )(*arrays)


def _chan_call(body, x3, out_dtype):
    """x3: (N, C, L) -> one full image per grid step (needed for per-image stats)."""
    N, C, L = x3.shape

    def kernel(x_ref, o_ref):
        o_ref[...] = body(x_ref[...]).astype(out_dtype)

    return pl.pallas_call(
        kernel,
        grid=(N,),
        in_specs=[pl.BlockSpec((1, C, L), lambda i: (i, 0, 0))],
        out_specs=pl.BlockSpec((1, C, L), lambda i: (i, 0, 0)),
        out_shape=jax.ShapeDtypeStruct((N, C, L), out_dtype),
        compiler_params=pltpu.CompilerParams(dimension_semantics=("parallel",)),
    )(x3)


# ----------------------------------------------------------------------------
# blur helpers (separable, edge-replicate padding done in VMEM)
# ----------------------------------------------------------------------------
def _gauss_weights(ksize, sigma):
    pad = ksize // 2
    w = [math.exp(-((i - pad) ** 2) / (2.0 * sigma * sigma)) for i in range(ksize)]
    s = sum(w)
    return [a / s for a in w], pad


def _shift_rep(v, d, axis):
    """y[..., i, ...] = v[..., clamp(i + d), ...] with edge replication."""
    if d == 0:
        return v
    n = v.shape[axis]
    if d > 0:
        core = lax.slice_in_dim(v, d, n, axis=axis)
        edge = lax.slice_in_dim(v, n - 1, n, axis=axis)
        pad = jnp.concatenate([edge] * d, axis=axis) if d > 1 else edge
        return jnp.concatenate([core, pad], axis=axis)
    d = -d
    core = lax.slice_in_dim(v, 0, n - d, axis=axis)
    edge = lax.slice_in_dim(v, 0, 1, axis=axis)
    pad = jnp.concatenate([edge] * d, axis=axis) if d > 1 else edge
    return jnp.concatenate([pad, core], axis=axis)


def _separable_blur(v, w1d, pad):
    # v: (bp, H, W) float32.  2k taps instead of k^2.
    acc = jnp.zeros(v.shape, jnp.float32)
    for t, wt in enumerate(w1d):
        acc = acc + jnp.float32(wt) * _shift_rep(v, t - pad, axis=1)
    out = jnp.zeros(v.shape, jnp.float32)
    for t, wt in enumerate(w1d):
        out = out + jnp.float32(wt) * _shift_rep(acc, t - pad, axis=2)
    return out


# ----------------------------------------------------------------------------
# individual noise ops
# ----------------------------------------------------------------------------
def gaussian_noise(x, sigma, seed):
    N, C, H, W = x.shape
    L = H * W
    x2 = x.reshape(N * C, L)

    def body(row0, v):
        idx = _global_idx_2d(v.shape, row0, L)
        return v + jnp.float32(sigma) * _normal_from_idx(idx, seed, salt=1)

    return _ew2d_call(body, [x2], x.dtype).reshape(N, C, H, W)


def salt_pepper(x, prob, seed):
    N, C, H, W = x.shape
    L = H * W
    x2 = x.reshape(N * C, L)

    def body(row0, v):
        idx = _global_idx_2d(v.shape, row0, L)
        u = _uniform_from_idx(idx, seed, salt=2)
        v = jnp.where(u < jnp.float32(prob * 0.5), jnp.float32(0.0), v)       # pepper
        v = jnp.where(u > jnp.float32(1.0 - prob * 0.5), jnp.float32(1.0), v)  # salt
        return v

    return _ew2d_call(body, [x2], x.dtype).reshape(N, C, H, W)


def dropout_mix(enc, cov, prob, seed):
    # with probability `prob` a pixel of `enc` is replaced by the cover pixel
    N, C, H, W = enc.shape
    L = H * W
    e2 = enc.reshape(N * C, L)
    c2 = cov.reshape(N * C, L)

    def body(row0, e, c):
        idx = _global_idx_2d(e.shape, row0, L)
        u = _uniform_from_idx(idx, seed, salt=3)
        m = (u < jnp.float32(prob)).astype(jnp.float32)
        return e * (1.0 - m) + c * m

    return _ew2d_call(body, [e2, c2], enc.dtype).reshape(N, C, H, W)


def poisson_noise(x, peak, seed):
    # TODO(synk): gaussian approximation of poisson shot noise (std = sqrt(x/peak)).
    N, C, H, W = x.shape
    L = H * W
    x2 = x.reshape(N * C, L)

    def body(row0, v):
        idx = _global_idx_2d(v.shape, row0, L)
        std = jnp.sqrt(jnp.maximum(v, 0.0) / jnp.float32(peak))
        return jnp.clip(v + std * _normal_from_idx(idx, seed, salt=4), 0.0, 1.0)

    return _ew2d_call(body, [x2], x.dtype).reshape(N, C, H, W)


def brightness(x, factor):
    N, C, H, W = x.shape
    x2 = x.reshape(N * C, H * W)

    def body(row0, v):
        return jnp.clip(v * jnp.float32(factor), 0.0, 1.0)

    return _ew2d_call(body, [x2], x.dtype).reshape(N, C, H, W)


def _center_rect(H, W, ratio):
    ch, cw = max(1, int(H * ratio)), max(1, int(W * ratio))
    h0, w0 = (H - ch) // 2, (W - cw) // 2
    return h0, h0 + ch, w0, w0 + cw


def _rect_mask(H, W, rect):
    h0, h1, w0, w1 = rect
    hi = lax.broadcasted_iota(jnp.int32, (1, H, W), 1)
    wi = lax.broadcasted_iota(jnp.int32, (1, H, W), 2)
    return ((hi >= h0) & (hi < h1) & (wi >= w0) & (wi < w1)).astype(jnp.float32)


def crop_mask(enc, ratio):
    # shape-preserving Crop approximation: keep a deterministic center rect, zero outside.
    N, C, H, W = enc.shape
    rect = _center_rect(H, W, ratio)
    e3 = enc.reshape(N * C, H, W)

    def body(p0, v):
        return v * _rect_mask(H, W, rect)

    return _ew3d_call(body, [e3], enc.dtype).reshape(N, C, H, W)


def cropout(enc, cov, ratio):
    # encoded inside the rectangle, cover outside
    N, C, H, W = enc.shape
    rect = _center_rect(H, W, ratio)
    e3 = enc.reshape(N * C, H, W)
    c3 = cov.reshape(N * C, H, W)

    def body(p0, e, c):
        m = _rect_mask(H, W, rect)
        return e * m + c * (1.0 - m)

    return _ew3d_call(body, [e3, c3], enc.dtype).reshape(N, C, H, W)


def gaussian_blur(x, ksize, sigma):
    # depthwise separable gaussian blur, several (N*C) planes per grid step.
    # TODO(synk): edge-replicate borders (torchvision default is reflect padding).
    N, C, H, W = x.shape
    w1d, pad = _gauss_weights(ksize, sigma)
    x3 = x.reshape(N * C, H, W)

    def body(p0, v):
        return _separable_blur(v.astype(jnp.float32), w1d, pad)

    return _ew3d_call(body, [x3], x.dtype).reshape(N, C, H, W)


def contrast(x, factor):
    N, C, H, W = x.shape
    x3 = x.reshape(N, C, H * W)

    def body(v):                                  # v: (1, 3, L)
        r, g, b = v[:, 0:1, :], v[:, 1:2, :], v[:, 2:3, :]
        gray = 0.299 * r + 0.587 * g + 0.114 * b
        mean = jnp.mean(gray)                     # per-image scalar
        return jnp.clip(mean + (v - mean) * jnp.float32(factor), 0.0, 1.0)

    return _chan_call(body, x3, x.dtype).reshape(N, C, H, W)


def saturation(x, factor):
    N, C, H, W = x.shape
    x3 = x.reshape(N, C, H * W)

    def body(v):
        r, g, b = v[:, 0:1, :], v[:, 1:2, :], v[:, 2:3, :]
        gray = 0.299 * r + 0.587 * g + 0.114 * b
        return jnp.clip(gray + (v - gray) * jnp.float32(factor), 0.0, 1.0)

    return _chan_call(body, x3, x.dtype).reshape(N, C, H, W)


def hue(x, hue_shift):
    # TODO(synk): YIQ-space rotation approximation of torchvision adjust_hue.
    N, C, H, W = x.shape
    L = H * W
    x3 = x.reshape(N, C, L)
    theta = 2.0 * math.pi * hue_shift
    cs, sn = math.cos(theta), math.sin(theta)

    def kernel(x_ref, o_ref):
        r, g, b = x_ref[:, 0:1, :], x_ref[:, 1:2, :], x_ref[:, 2:3, :]
        y = 0.299 * r + 0.587 * g + 0.114 * b
        i = 0.596 * r - 0.274 * g - 0.322 * b
        q = 0.211 * r - 0.523 * g + 0.312 * b
        i2 = cs * i - sn * q
        q2 = sn * i + cs * q
        # direct per-channel stores (no concatenate / relayout)
        o_ref[:, 0:1, :] = jnp.clip(y + 0.956 * i2 + 0.621 * q2, 0.0, 1.0).astype(o_ref.dtype)
        o_ref[:, 1:2, :] = jnp.clip(y - 0.272 * i2 - 0.647 * q2, 0.0, 1.0).astype(o_ref.dtype)
        o_ref[:, 2:3, :] = jnp.clip(y - 1.106 * i2 + 1.703 * q2, 0.0, 1.0).astype(o_ref.dtype)

    out = pl.pallas_call(
        kernel,
        grid=(N,),
        in_specs=[pl.BlockSpec((1, C, L), lambda i: (i, 0, 0))],
        out_specs=pl.BlockSpec((1, C, L), lambda i: (i, 0, 0)),
        out_shape=jax.ShapeDtypeStruct((N, C, L), x.dtype),
        compiler_params=pltpu.CompilerParams(dimension_semantics=("parallel",)),
    )(x3)
    return out.reshape(N, C, H, W)


def superposition_fused(enc, cov, blur_ks, blur_sigma, noise_sigma, bright, ratio, seed):
    """Fused default Superposition chain: blur -> gaussian noise -> brightness -> cropout."""
    N, C, H, W = enc.shape
    P = N * C
    e3 = enc.reshape(P, H, W)
    c3 = cov.reshape(P, H, W)
    w1d, pad = _gauss_weights(blur_ks, blur_sigma)
    h0, h1, w0, w1 = _center_rect(H, W, ratio)
    bp = _largest_divisor(P, max(1, _BLOCK_BYTES // (H * W * 4)))

    def kernel(e_ref, c_ref, o_ref):
        p0 = pl.program_id(0) * bp
        v = _separable_blur(e_ref[...].astype(jnp.float32), w1d, pad)
        pi = lax.broadcasted_iota(jnp.int32, (bp, H, W), 0) + p0
        hi = lax.broadcasted_iota(jnp.int32, (bp, H, W), 1)
        wi = lax.broadcasted_iota(jnp.int32, (bp, H, W), 2)
        idx = (pi * jnp.int32(H) + hi) * jnp.int32(W) + wi
        v = v + jnp.float32(noise_sigma) * _normal_from_idx(idx, seed, salt=11)
        v = jnp.clip(v * jnp.float32(bright), 0.0, 1.0)
        m = ((hi >= h0) & (hi < h1) & (wi >= w0) & (wi < w1)).astype(jnp.float32)
        v = v * m + c_ref[...].astype(jnp.float32) * (1.0 - m)
        o_ref[...] = v.astype(o_ref.dtype)

    out = pl.pallas_call(
        kernel,
        grid=(P // bp,),
        in_specs=[pl.BlockSpec((bp, H, W), lambda i: (i, 0, 0)),
                  pl.BlockSpec((bp, H, W), lambda i: (i, 0, 0))],
        out_specs=pl.BlockSpec((bp, H, W), lambda i: (i, 0, 0)),
        out_shape=jax.ShapeDtypeStruct((P, H, W), enc.dtype),
        compiler_params=pltpu.CompilerParams(dimension_semantics=("parallel",)),
    )(e3, c3)
    return out.reshape(N, C, H, W)


# ----------------------------------------------------------------------------
# Noise_pool equivalent
# ----------------------------------------------------------------------------
class NoisePoolPallas:
    _FUSED_POOL = ["GaussianBlur", "GaussianNoise", "Brightness", "Cropout"]

    def __init__(self, opt):
        self.opt = opt
        n = opt["noise"]
        self.si_pool = list(n["Superposition"]["si_pool"])
        self.shuffle = n["Superposition"]["shuffle"]  # kept False for determinism
        self.one_input_parms = ["Rotation", "Affine"]
        self._keys = [
            "Identity", "JpegTest", "Jpeg", "Crop", "Resize", "GaussianBlur",
            "Salt_Pepper", "GaussianNoise", "GaussianNoiseEditGuard", "DiffJPEG",
            "PoissonNoise", "Brightness", "Contrast", "Saturation", "Hue",
            "Rotation", "Affine", "Cropout", "Dropout",
        ]
        self._seed_off = {k: i + 1 for i, k in enumerate(self._keys)}

    # mirrors Noise_pool.noise_pool()
    def noise_pool(self):
        return {k: getattr(self, "_" + k) for k in self._keys}

    # mirrors Noise_pool.forward(encoded, cover_img, noise_choice)
    def forward(self, encoded, cover_img, noise_choice, seed=0):
        if noise_choice == "Superposition":
            return self.Superposition(encoded, cover_img, seed)
        fn = self.noise_pool()[noise_choice]
        op_seed = seed * 131 + self._seed_off[noise_choice]
        if noise_choice in self.one_input_parms:
            return fn(encoded, seed=op_seed)
        return fn(encoded, cover_img, seed=op_seed)

    __call__ = forward

    def Superposition(self, encoded, cover_img, seed=0):
        # TODO(synk): random.shuffle of si_pool disabled (shuffle=False) for determinism.
        n = self.opt["noise"]
        if (not self.shuffle) and self.si_pool == self._FUSED_POOL:
            # single fused kernel: 1 HBM round trip instead of 4
            return superposition_fused(
                encoded, cover_img,
                n["GaussianBlur"]["kernel_size"], n["GaussianBlur"]["sigma"],
                n["GaussianNoise"]["sigma"], n["Brightness"]["factor"],
                n["Cropout"]["ratio"], seed * 131 + 1000)
        out = encoded
        for idx, key in enumerate(self.si_pool):
            op_seed = seed * 131 + 1000 + idx
            if key in self.one_input_parms:
                out = self.noise_pool()[key](out, seed=op_seed)
            else:
                out = self.noise_pool()[key](out, cover_img, seed=op_seed)
        return out

    # ---- individual layers (two-input unless noted) ----
    def _Identity(self, enc, cov=None, seed=0):
        return enc                                   # pass-through, no copy kernel

    def _JpegTest(self, enc, cov=None, seed=0):
        # TODO(synk): real JPEG round-trip (file encode/decode) has no Pallas equivalent.
        return enc

    def _Jpeg(self, enc, cov=None, seed=0):
        # TODO(synk): differentiable JPEG (DCT + quantization tables) not translated.
        return enc

    def _DiffJPEG(self, enc, cov=None, seed=0):
        # TODO(synk): DiffJPEG pipeline not translated.
        return enc

    def _Resize(self, enc, cov=None, seed=0):
        # TODO(synk): interpolated down/up-sampling (gather) not translated.
        return enc

    def _Rotation(self, enc, seed=0):
        # TODO(synk): kornia RandomRotation (grid_sample warp) not translated.
        return enc

    def _Affine(self, enc, seed=0):
        # TODO(synk): kornia RandomAffine (grid_sample warp) not translated.
        return enc

    def _Crop(self, enc, cov=None, seed=0):
        return crop_mask(enc, self.opt["noise"]["Crop"]["ratio"])

    def _Cropout(self, enc, cov=None, seed=0):
        return cropout(enc, cov, self.opt["noise"]["Cropout"]["ratio"])

    def _Dropout(self, enc, cov=None, seed=0):
        return dropout_mix(enc, cov, self.opt["noise"]["Dropout"]["prob"], seed)

    def _GaussianBlur(self, enc, cov=None, seed=0):
        p = self.opt["noise"]["GaussianBlur"]
        return gaussian_blur(enc, p["kernel_size"], p["sigma"])

    def _Salt_Pepper(self, enc, cov=None, seed=0):
        return salt_pepper(enc, self.opt["noise"]["Salt_Pepper"]["prob"], seed)

    def _GaussianNoise(self, enc, cov=None, seed=0):
        return gaussian_noise(enc, self.opt["noise"]["GaussianNoise"]["sigma"], seed)

    def _GaussianNoiseEditGuard(self, enc, cov=None, seed=0):
        return gaussian_noise(
            enc, self.opt["noise"]["GaussianNoiseEditGuard"]["sigma"], seed)

    def _PoissonNoise(self, enc, cov=None, seed=0):
        return poisson_noise(enc, self.opt["noise"]["PoissonNoise"]["peak"], seed)

    def _Brightness(self, enc, cov=None, seed=0):
        return brightness(enc, self.opt["noise"]["Brightness"]["factor"])

    def _Contrast(self, enc, cov=None, seed=0):
        return contrast(enc, self.opt["noise"]["Contrast"]["factor"])

    def _Saturation(self, enc, cov=None, seed=0):
        return saturation(enc, self.opt["noise"]["Saturation"]["factor"])

    def _Hue(self, enc, cov=None, seed=0):
        return hue(enc, self.opt["noise"]["Hue"]["factor"])


# ----------------------------------------------------------------------------
# deterministic "opt" configuration (synthetic, mirrors __init__ usage)
# ----------------------------------------------------------------------------
OPT = {
    "noise": {
        "Superposition": {
            "si_pool": ["GaussianBlur", "GaussianNoise", "Brightness", "Cropout"],
            "shuffle": False,
        },
        "JpegTest": {"Q": 50, "subsample": 2},
        "Jpeg": {"Q": 50, "subsample": 2, "differentiable": True},
        "Crop": {"ratio": 0.5},
        "Resize": {"scale": 0.5},
        "GaussianBlur": {"kernel_size": 3, "sigma": 1.0},
        "Salt_Pepper": {"prob": 0.05},
        "GaussianNoise": {"sigma": 0.05},
        "GaussianNoiseEditGuard": {"sigma": 0.1},
        "PoissonNoise": {"peak": 255.0},
        "Brightness": {"factor": 1.2},
        "Contrast": {"factor": 1.2},
        "Saturation": {"factor": 1.2},
        "Hue": {"factor": 0.1},
        "Rotation": {"degrees": 10.0, "p": 1.0},
        "Affine": {"degrees": 10.0, "translate": (0.1, 0.1), "scale": (0.9, 1.1),
                   "shear": 5.0, "p": 1.0},
        "Cropout": {"ratio": 0.5},
        "Dropout": {"prob": 0.3},
    },
    "path": {"folder_temp": "/tmp"},
    "DiffJPEG": 80,
}


if __name__ == "__main__":
    key = jax.random.PRNGKey(0)
    k1, k2 = jax.random.split(key)
    # NCHW RGB images (small demo shapes consistent with the forward pass)
    encoded = jax.random.uniform(k1, (2, 3, 16, 16), dtype=jnp.float32)
    cover_img = jax.random.uniform(k2, (2, 3, 16, 16), dtype=jnp.float32)

    pool = NoisePoolPallas(OPT)

    choices = [
        "Identity", "GaussianNoise", "GaussianNoiseEditGuard", "Salt_Pepper",
        "GaussianBlur", "Brightness", "Contrast", "Saturation", "Hue",
        "Crop", "Cropout", "Dropout", "PoissonNoise", "Rotation", "Affine",
        "Jpeg", "JpegTest", "DiffJPEG", "Resize", "Superposition",
    ]
    outs = []
    for choice in choices:
        outs.append(pool(encoded, cover_img, choice, seed=0))

    outs = jax.block_until_ready(outs)
    assert all(o.shape == encoded.shape and o.dtype == encoded.dtype for o in outs)
    assert all(bool(jnp.all(jnp.isfinite(o))) for o in outs)
    print("KERNEL_OK")
</pallas_src>

<mosaic_0001>
module attributes {stable_mosaic.version = 11 : i64} {
  func.func @kernel(%arg0: i32, %arg1: memref<6x256xf32, #tpu.memory_space<vmem>>, %arg2: memref<6x256xf32, #tpu.memory_space<vmem>>) attributes {dimension_semantics = [#tpu.dimension_semantics<parallel>], iteration_bounds = array<i64: 1>, scalar_prefetch = 0 : i64, scratch_operands = 0 : i64, tpu.core_type = #tpu.core_type<tc>, window_params = [{transform_indices = @transform_0, window_bounds = array<i64: 6, 256>}, {transform_indices = @transform_1, window_bounds = array<i64: 6, 256>}]} {
    %c0 = arith.constant 0 : index
    %c0_0 = arith.constant 0 : index
    %0 = vector.load %arg1[%c0, %c0_0] : memref<6x256xf32, #tpu.memory_space<vmem>>, vector<6x256xf32>
    %c6_i32 = arith.constant 6 : i32
    %1 = arith.muli %arg0, %c6_i32 : i32
    %2 = tpu.iota {dimensions = array<i32: 0>} : vector<6x256xi32>
    %3 = vector.broadcast %1 : i32 to vector<6x256xi32>
    %4 = arith.addi %2, %3 : vector<6x256xi32>
    %5 = tpu.iota {dimensions = array<i32: 1>} : vector<6x256xi32>
    %c256_i32 = arith.constant 256 : i32
    %6 = vector.broadcast %c256_i32 : i32 to vector<6x256xi32>
    %7 = arith.muli %4, %6 : vector<6x256xi32>
    %8 = arith.addi %7, %5 : vector<6x256xi32>
    %c-1879800913_i32 = arith.constant -1879800913 : i32
    %9 = vector.broadcast %c-1879800913_i32 : i32 to vector<6x256xi32>
    %10 = arith.addi %8, %9 : vector<6x256xi32>
    %c16_i32 = arith.constant 16 : i32
    %11 = vector.broadcast %c16_i32 : i32 to vector<6x256xi32>
    %12 = arith.shrui %10, %11 : vector<6x256xi32>
    %13 = arith.xori %10, %12 : vector<6x256xi32>
    %c2146121005_i32 = arith.constant 2146121005 : i32
    %14 = vector.broadcast %c2146121005_i32 : i32 to vector<6x256xi32>
    %15 = arith.muli %13, %14 : vector<6x256xi32>
    %c15_i32 = arith.constant 15 : i32
    %16 = vector.broadcast %c15_i32 : i32 to vector<6x256xi32>
    %17 = arith.shrui %15, %16 : vector<6x256xi32>
    %18 = arith.xori %15, %17 : vector<6x256xi32>
    %c-2073254261_i32 = arith.constant -2073254261 : i32
    %19 = vector.broadcast %c-2073254261_i32 : i32 to vector<6x256xi32>
    %20 = arith.muli %18, %19 : vector<6x256xi32>
    %c16_i32_1 = arith.constant 16 : i32
    %21 = vector.broadcast %c16_i32_1 : i32 to vector<6x256xi32>
    %22 = arith.shrui %20, %21 : vector<6x256xi32>
    %23 = arith.xori %20, %22 : vector<6x256xi32>
    %c-1879760410_i32 = arith.constant -1879760410 : i32
    %24 = vector.broadcast %c-1879760410_i32 : i32 to vector<6x256xi32>
    %25 = arith.addi %8, %24 : vector<6x256xi32>
    %c16_i32_2 = arith.constant 16 : i32
    %26 = vector.broadcast %c16_i32_2 : i32 to vector<6x256xi32>
    %27 = arith.shrui %25, %26 : vector<6x256xi32>
    %28 = arith.xori %25, %27 : vector<6x256xi32>
    %c2146121005_i32_3 = arith.constant 2146121005 : i32
    %29 = vector.broadcast %c2146121005_i32_3 : i32 to vector<6x256xi32>
    %30 = arith.muli %28, %29 : vector<6x256xi32>
    %c15_i32_4 = arith.constant 15 : i32
    %31 = vector.broadcast %c15_i32_4 : i32 to vector<6x256xi32>
    %32 = arith.shrui %30, %31 : vector<6x256xi32>
    %33 = arith.xori %30, %32 : vector<6x256xi32>
    %c-2073254261_i32_5 = arith.constant -2073254261 : i32
    %34 = vector.broadcast %c-2073254261_i32_5 : i32 to vector<6x256xi32>
    %35 = arith.muli %33, %34 : vector<6x256xi32>
    %c16_i32_6 = arith.constant 16 : i32
    %36 = vector.broadcast %c16_i32_6 : i32 to vector<6x256xi32>
    %37 = arith.shrui %35, %36 : vector<6x256xi32>
    %38 = arith.xori %35, %37 : vector<6x256xi32>
    %c65535_i32 = arith.constant 65535 : i32
    %39 = vector.broadcast %c65535_i32 : i32 to vector<6x256xi32>
    %40 = arith.andi %23, %39 : vector<6x256xi32>
    %41 = arith.sitofp %40 : vector<6x256xi32> to vector<6x256xf32>
    %c16_i32_7 = arith.constant 16 : i32
    %42 = vector.broadcast %c16_i32_7 : i32 to vector<6x256xi32>
    %43 = arith.shrui %23, %42 : vector<6x256xi32>
    %44 = arith.sitofp %43 : vector<6x256xi32> to vector<6x256xf32>
    %45 = arith.addf %41, %44 : vector<6x256xf32>
    %c65535_i32_8 = arith.constant 65535 : i32
    %46 = vector.broadcast %c65535_i32_8 : i32 to vector<6x256xi32>
    %47 = arith.andi %38, %46 : vector<6x256xi32>
    %48 = arith.sitofp %47 : vector<6x256xi32> to vector<6x256xf32>
    %49 = arith.addf %45, %48 : vector<6x256xf32>
    %c16_i32_9 = arith.constant 16 : i32
    %50 = vector.broadcast %c16_i32_9 : i32 to vector<6x256xi32>
    %51 = arith.shrui %38, %50 : vector<6x256xi32>
    %52 = arith.sitofp %51 : vector<6x256xi32> to vector<6x256xf32>
    %53 = arith.addf %49, %52 : vector<6x256xf32>
    %cst = arith.constant 1.52587891E-5 : f32
    %54 = vector.broadcast %cst : f32 to vector<6x256xf32>
    %55 = arith.mulf %53, %54 : vector<6x256xf32>
    %cst_10 = arith.constant 2.000000e+00 : f32
    %56 = vector.broadcast %cst_10 : f32 to vector<6x256xf32>
    %57 = arith.subf %55, %56 : vector<6x256xf32>
    %cst_11 = arith.constant 1.73205078 : f32
    %58 = vector.broadcast %cst_11 : f32 to vector<6x256xf32>
    %59 = arith.mulf %57, %58 : vector<6x256xf32>
    %cst_12 = arith.constant 5.000000e-02 : f32
    %60 = vector.broadcast %cst_12 : f32 to vector<6x256xf32>
    %61 = arith.mulf %60, %59 : vector<6x256xf32>
    %62 = arith.addf %0, %61 : vector<6x256xf32>
    %c0_13 = arith.constant 0 : index
    %c0_14 = arith.constant 0 : index
    %63 = vector.load %arg2[%c0_13, %c0_14] : memref<6x256xf32, #tpu.memory_space<vmem>>, vector<6x256xf32>
    tpu.vector_store %arg2[%c0_13, %c0_14], %62 {strides = array<i32>} : memref<6x256xf32, #tpu.memory_space<vmem>>, vector<6x256xf32>,
    return
  }
  func.func @transform_0(%arg0: i32) -> (i32, i32) {
    %c0_i32 = arith.constant 0 : i32
    %c0_i32_0 = arith.constant 0 : i32
    return %arg0, %c0_i32 : i32, i32
  }
  func.func @transform_1(%arg0: i32) -> (i32, i32) {
    %c0_i32 = arith.constant 0 : i32
    %c0_i32_0 = arith.constant 0 : i32
    return %arg0, %c0_i32 : i32, i32
  }
}

</mosaic_0001>

<bundles_post_ra>
// kernel: tpu_custom_call.1
= control target key start
LH: loop header
LB: loop body
LE: loop exit
PB: predicated region body
PF: predicated region fallthrough
CT: control target
= control target key end

     0   :  { %6 = vsyncpa [#allocation3], 0  ;;  %s197_s0 = inlined_call_operand.hbm [shape: f32[6,256], index: 0, kind: input, shape index: {}]   ;;  %s198_s1 = inlined_call_operand.hbm [shape: f32[6,256], index: 1, kind: output, shape index: {}]  }
   0x1   :  { %7 = vsyncpa [#allocation4], 0  ;;  %s13_s8 = sshll.u32 %s197_s0, 4  ;;  %s179_s9 = smov [#allocation2]   ;;  %s14_s8 = int_to_ptr.hbm [resolvable:$true] %s13_s8 }
   0x2   :  { %s15_s10 = sshll.u32 %s179_s9, 4  ;;  %s16_s10 = int_to_ptr.vmem [resolvable:$true] %s15_s10 }
   0x3   :  { %18 = dma.hbm_to_vmem [thread:$0]  %s14_s8, 256, %s16_s10, [#allocation3]  }
   0x4   :  { %175 = dma.done.wait [#allocation3], 256  }
   0x5   :  { %176 = vsyncadd [#allocation3], 4294967040  ;;  %v26_v0 = vlaneseq  ;;  %s180_s0 = smov [#allocation5]   ;;  %s113_s14 = sshll.u32 %s198_s1, 4  ;;  %s114_s14 = int_to_ptr.hbm [resolvable:$true] %s113_s14 }
   0x6   :  { %s111_s11 = sshll.u32 %s180_s0, 4  ;;  %s112_s11 = int_to_ptr.vmem [resolvable:$true] %s111_s11 }
   0x7   :  { %v27_v1 = vshrl.u32 %v26_v0, 7  ;;  %v31_v2 = vand.u32 127, %v26_v0 }
   0x9   :  { %v33_v3 = vmul.u32 256, %v27_v1  ;;  %v32_v4 = vadd.s32 128, %v31_v2 }
   0xb   :  { %v34_v5 = vadd.s32 %v33_v3, %v31_v2  ;;  %v35_v6 = vadd.s32 %v33_v3, %v32_v4 }
   0xd   :  { %v36_v7 = vadd.s32 2415166383, %v34_v5  ;;  %v54_v8 = vadd.s32 2415206886, %v34_v5  ;;  %v37_v9 = vadd.s32 2415166383, %v35_v6 }
   0xe   :  { %v55_v10 = vadd.s32 2415206886, %v35_v6  ;;  %v23_v6 = vld [vmem:[#allocation2] sm:$0x3f] }
   0xf   :  { %v38_v11 = vshrl.u32 %v36_v7, 16  ;;  %v56_v12 = vshrl.u32 %v54_v8, 16  ;;  %v39_v13 = vshrl.u32 %v37_v9, 16 }
  0x10   :  { %v57_v14 = vshrl.u32 %v55_v10, 16 }
  0x11   :  { %v40_v15 = vxor.u32 %v38_v11, %v36_v7  ;;  %v58_v16 = vxor.u32 %v56_v12, %v54_v8  ;;  %v41_v17 = vxor.u32 %v39_v13, %v37_v9  ;;  %v24_v9 = vld [vmem:[#allocation2 + $0x8] sm:$0x3f] }
  0x12   :  { %v59_v18 = vxor.u32 %v57_v14, %v55_v10 }
  0x13   :  { %v42_v19 = vmul.u32 2146121005, %v40_v15  ;;  %v60_v20 = vmul.u32 2146121005, %v58_v16  ;;  %v43_v21 = vmul.u32 2146121005, %v41_v17 }
  0x14   :  { %v61_v22 = vmul.u32 2146121005, %v59_v18 }
  0x15   :  { %v44_v23 = vshrl.u32 %v42_v19, 15  ;;  %v62_v24 = vshrl.u32 %v60_v20, 15  ;;  %v45_v25 = vshrl.u32 %v43_v21, 15 }
  0x16   :  { %v63_v26 = vshrl.u32 %v61_v22, 15 }
  0x17   :  { %v46_v27 = vxor.u32 %v44_v23, %v42_v19  ;;  %v64_v28 = vxor.u32 %v62_v24, %v60_v20  ;;  %v47_v29 = vxor.u32 %v45_v25, %v43_v21 }
  0x18   :  { %v65_v30 = vxor.u32 %v63_v26, %v61_v22 }
  0x19   :  { %v48_v31 = vmul.u32 2221713035, %v46_v27  ;;  %v66_v32 = vmul.u32 2221713035, %v64_v28  ;;  %v49_v33 = vmul.u32 2221713035, %v47_v29 }
  0x1a   :  { %v67_v34 = vmul.u32 2221713035, %v65_v30 }
  0x1b   :  { %v50_v35 = vshrl.u32 %v48_v31, 16  ;;  %v68_v36 = vshrl.u32 %v66_v32, 16  ;;  %v51_v37 = vshrl.u32 %v49_v33, 16 }
  0x1c   :  { %v69_v38 = vshrl.u32 %v67_v34, 16 }
  0x1d   :  { %v52_v39 = vxor.u32 %v50_v35, %v48_v31  ;;  %v70_v40 = vxor.u32 %v68_v36, %v66_v32  ;;  %v53_v41 = vxor.u32 %v51_v37, %v49_v33 }
  0x1e   :  { %v71_v42 = vxor.u32 %v69_v38, %v67_v34 }
  0x1f   :  { %v72_v43 = vand.u32 65535, %v52_v39  ;;  %v76_v44 = vshrl.u32 %v52_v39, 16  ;;  %v82_v45 = vand.u32 65535, %v70_v40  ;;  %v88_v46 = vshrl.u32 %v70_v40, 16 }
  0x20   :  { %v73_v47 = vand.u32 65535, %v53_v41  ;;  %v77_v48 = vshrl.u32 %v53_v41, 16  ;;  %v83_v49 = vand.u32 65535, %v71_v42  ;;  %v89_v50 = vshrl.u32 %v71_v42, 16 }
  0x21   :  { %v74_v51 = vcvt.s32.f32 %v72_v43  ;;  %v78_v52 = vcvt.s32.f32 %v76_v44  ;;  %v84_v53 = vcvt.s32.f32 %v82_v45  ;;  %v90_v58 = vcvt.s32.f32 %v88_v46 }
  0x22   :  { %v75_v54 = vcvt.s32.f32 %v73_v47  ;;  %v79_v55 = vcvt.s32.f32 %v77_v48  ;;  %v85_v56 = vcvt.s32.f32 %v83_v49  ;;  %v91_v60 = vcvt.s32.f32 %v89_v50 }
  0x23   :  { %v80_v57 = vadd.f32 %v78_v52, %v74_v51 }
  0x24   :  { %v81_v59 = vadd.f32 %v79_v55, %v75_v54 }
  0x25   :  { %v86_v61 = vadd.f32 %v84_v53, %v80_v57 }
  0x26   :  { %v87_v62 = vadd.f32 %v85_v56, %v81_v59 }
  0x27   :  { %v92_v63 = vadd.f32 %v90_v58, %v86_v61 }
  0x28   :  { %v93_v0 = vadd.f32 %v91_v60, %v87_v62 }
  0x29   :  { %v94_v1 = vmul.f32 1.5258789e-05, %v92_v63 }
  0x2a   :  { %v95_v2 = vmul.f32 1.5258789e-05, %v93_v0 }
  0x2b   :  { %v123_v3 = vadd.f32 -2.0, %v94_v1 }
  0x2c   :  { %v124_v4 = vadd.f32 -2.0, %v95_v2 }
  0x2d   :  { %v98_v5 = vmul.f32 1.7320508, %v123_v3 }
  0x2e   :  { %v99_v7 = vmul.f32 1.7320508, %v124_v4 }
  0x2f   :  { %v100_v8 = vmul.f32 0.05, %v98_v5 }
  0x30   :  { %v101_v10 = vmul.f32 0.05, %v99_v7 }
  0x31   :  { %v102_v11 = vadd.f32 %v100_v8, %v23_v6 }
  0x32   :  { %v103_v12 = vadd.f32 %v101_v10, %v24_v9 }
  0x33   :  { %104 = vst [vmem:[#allocation5] sm:$0x3f] %v102_v11 }
  0x34   :  { %105 = vst [vmem:[#allocation5 + $0x8] sm:$0x3f] %v103_v12 }
  0x35   :  { %116 = dma.vmem_to_hbm [thread:$0]  %s112_s11, 256, %s114_s14, [#allocation4]  }
  0x36   :  { %177 = dma.done.wait [#allocation4], 256  }
  0x37   :  { %178 = vsyncadd [#allocation4], 4294967040 }
  0x38   :  { %121 = vsyncpa [#allocation3], 1 }
  0x39   :  { %122 = vsyncpa [#allocation4], 1 }

</bundles_post_ra>
